<compile_context>
chip_gen: v7x
topology: tpu7x:2x2x1
jax: 0.10.0
libtpu: 0.0.40
codegen_flags: <defaults>
</compile_context>

<pallas_src>
import jax
import jax.numpy as jnp
from jax.experimental import pallas as pl
from jax.experimental.pallas import tpu as pltpu


def simple_fc_kernel(x_ref, w1t_ref, b1_ref, w2c_ref, b2_ref, o_ref):
    # x_ref:   (6,  TB) f32   batch-on-lanes tile
    # w1t_ref: (15, 6)  f32   fc1 weight, transposed (out, in)
    # b1_ref:  (15, 1)  f32   fc1 bias column (broadcasts across lanes)
    # w2c_ref: (15, 1)  f32   fc2 weight column
    # b2_ref:  (1,)     f32   fc2 bias (SMEM scalar)
    # o_ref:   (1,  TB) f32   lane-dense output tile
    x = x_ref[...]
    # fc1 on the MXU: (15,6) @ (6,TB) -> (15,TB), f32 accumulate.
    h = jnp.dot(w1t_ref[...], x, preferred_element_type=jnp.float32)
    h = jnp.maximum(h + b1_ref[...], 0.0)                      # bias + ReLU (VPU)
    # fc2 has one output feature: VPU mul + sublane reduction (XLU), avoids a
    # 1-row MXU matmul entirely.
    y = jnp.sum(h * w2c_ref[...], axis=0, keepdims=True)       # (1, TB)
    o_ref[...] = (y + b2_ref[0]).astype(o_ref.dtype)


def simple_fc(x, w1, b1, w2, b2, *, tb=512):
    """x: (B, 6); w1: (6,15); b1: (1,15); w2: (15,1); b2: (1,1).
    Returns (B, 1) f32, identical math to the PyTorch forward.

    Note: for genuinely tiny B a plain fused XLA matmul is competitive; this
    kernel targets large-batch inference where the batch-on-lanes layout pays.
    """
    B, in_f = x.shape
    hid = w1.shape[1]          # 15
    out_f = w2.shape[1]        # 1

    # Lane tile: multiple of 128, capped so tiny batches are not over-padded.
    tb = max(128, (tb // 128) * 128)
    tb = min(tb, pl.cdiv(B, 128) * 128)
    n_blocks = pl.cdiv(B, tb)
    Bp = n_blocks * tb

    # One-time wrapper-side layout work (not per grid step).
    xt = jnp.zeros((in_f, Bp), jnp.float32).at[:, :B].set(x.T)   # (6, Bp)
    w1t = w1.T.astype(jnp.float32)                               # (15, 6)
    b1c = b1.reshape(hid, 1).astype(jnp.float32)                 # (15, 1)
    w2c = w2.reshape(hid, out_f).astype(jnp.float32)             # (15, 1)
    b2s = b2.reshape(out_f).astype(jnp.float32)                  # (1,) SMEM scalar

    yt = pl.pallas_call(
        simple_fc_kernel,
        out_shape=jax.ShapeDtypeStruct((out_f, Bp), jnp.float32),
        grid=(n_blocks,),
        in_specs=[
            pl.BlockSpec((in_f, tb), lambda i: (0, i)),          # x tile (pipelined)
            pl.BlockSpec((hid, in_f), lambda i: (0, 0)),         # W1^T resident
            pl.BlockSpec((hid, 1), lambda i: (0, 0)),            # b1 resident
            pl.BlockSpec((hid, out_f), lambda i: (0, 0)),        # w2 column resident
            pl.BlockSpec(memory_space=pltpu.MemorySpace.SMEM),   # b2 scalar
        ],
        out_specs=pl.BlockSpec((out_f, tb), lambda i: (0, i)),
        compiler_params=pltpu.CompilerParams(
            # Batch axis is fully independent -> shard across TCs on v7x.
            dimension_semantics=("parallel",),
        ),
    )(xt, w1t, b1c, w2c, b2s)

    # Drop padding and return batch-major (B, 1) to match the PyTorch module.
    return yt[:, :B].T


def init_params(key):
    """Deterministic PyTorch-style uniform(-1/sqrt(fan_in), 1/sqrt(fan_in)) init."""
    k1, k2, k3, k4 = jax.random.split(key, 4)
    bound1 = 1.0 / jnp.sqrt(6.0)
    bound2 = 1.0 / jnp.sqrt(15.0)
    w1 = jax.random.uniform(k1, (6, 15), jnp.float32, -bound1, bound1)
    b1 = jax.random.uniform(k2, (1, 15), jnp.float32, -bound1, bound1)
    w2 = jax.random.uniform(k3, (15, 1), jnp.float32, -bound2, bound2)
    b2 = jax.random.uniform(k4, (1, 1), jnp.float32, -bound2, bound2)
    return w1, b1, w2, b2


if __name__ == "__main__":
    key = jax.random.PRNGKey(0)
    kx, kp = jax.random.split(key)

    B = 8
    x = jax.random.normal(kx, (B, 6), jnp.float32)
    w1, b1, w2, b2 = init_params(kp)

    out = simple_fc(x, w1, b1, w2, b2)
    out = jax.block_until_ready(out)

    # Reference check in plain JAX (same math as the PyTorch forward).
    ref = jnp.maximum(x @ w1 + b1, 0.0) @ w2 + b2
    assert out.shape == (B, 1)
    assert jnp.allclose(out, ref, atol=1e-5, rtol=1e-5)

    print("KERNEL_OK")
</pallas_src>

<mosaic_0001>
module attributes {stable_mosaic.version = 11 : i64} {
  func.func @simple_fc_kernel(%arg0: i32, %arg1: memref<6x128xf32, #tpu.memory_space<vmem>>, %arg2: memref<15x6xf32, #tpu.memory_space<vmem>>, %arg3: memref<15x1xf32, #tpu.memory_space<vmem>>, %arg4: memref<15x1xf32, #tpu.memory_space<vmem>>, %arg5: memref<1xf32, #tpu.memory_space<smem>>, %arg6: memref<1x128xf32, #tpu.memory_space<vmem>>) attributes {dimension_semantics = [#tpu.dimension_semantics<parallel>], iteration_bounds = array<i64: 1>, scalar_prefetch = 0 : i64, scratch_operands = 0 : i64, tpu.core_type = #tpu.core_type<tc>, window_params = [{transform_indices = @transform_0, window_bounds = array<i64: 6, 128>}, {pipeline_mode = #tpu.pipeline_mode<synchronous>, transform_indices = @transform_1, window_bounds = array<i64: 15, 6>}, {pipeline_mode = #tpu.pipeline_mode<synchronous>, transform_indices = @transform_2, window_bounds = array<i64: 15, 1>}, {pipeline_mode = #tpu.pipeline_mode<synchronous>, transform_indices = @transform_3, window_bounds = array<i64: 15, 1>}, {transform_indices = @transform_4, window_bounds = array<i64: 1>}, {transform_indices = @transform_5, window_bounds = array<i64: 1, 128>}]} {
    %c0 = arith.constant 0 : index
    %c0_0 = arith.constant 0 : index
    %0 = vector.load %arg1[%c0, %c0_0] : memref<6x128xf32, #tpu.memory_space<vmem>>, vector<6x128xf32>
    %c0_1 = arith.constant 0 : index
    %c0_2 = arith.constant 0 : index
    %1 = vector.load %arg2[%c0_1, %c0_2] : memref<15x6xf32, #tpu.memory_space<vmem>>, vector<15x6xf32>
    %cst = arith.constant dense<0.000000e+00> : vector<15x128xf32>
    %2 = tpu.matmul %1, %0, %cst {dimension_numbers = #tpu.dot_dimension_numbers<[1], [0], [0], [1], [0, 0, 1, 1], [], []>} : vector<15x6xf32>, vector<6x128xf32>, vector<15x128xf32> -> vector<15x128xf32>
    %c0_3 = arith.constant 0 : index
    %c0_4 = arith.constant 0 : index
    %3 = vector.load %arg3[%c0_3, %c0_4] : memref<15x1xf32, #tpu.memory_space<vmem>>, vector<15x1xf32>
    %4 = vector.broadcast %3 : vector<15x1xf32> to vector<15x128xf32>
    %5 = arith.addf %2, %4 : vector<15x128xf32>
    %cst_5 = arith.constant 0.000000e+00 : f32
    %6 = vector.broadcast %cst_5 : f32 to vector<15x128xf32>
    %7 = arith.maximumf %5, %6 : vector<15x128xf32>
    %c0_6 = arith.constant 0 : index
    %c0_7 = arith.constant 0 : index
    %8 = vector.load %arg4[%c0_6, %c0_7] : memref<15x1xf32, #tpu.memory_space<vmem>>, vector<15x1xf32>
    %9 = vector.broadcast %8 : vector<15x1xf32> to vector<15x128xf32>
    %10 = arith.mulf %7, %9 : vector<15x128xf32>
    %cst_8 = arith.constant dense<0.000000e+00> : vector<128xf32>
    %11 = vector.multi_reduction <add>, %10, %cst_8 [0] : vector<15x128xf32> to vector<128xf32>
    %12 = vector.shape_cast %11 : vector<128xf32> to vector<1x128xf32>
    %c0_9 = arith.constant 0 : index
    %13 = memref.load %arg5[%c0_9] : memref<1xf32, #tpu.memory_space<smem>>
    %14 = vector.broadcast %13 : f32 to vector<1x128xf32>
    %15 = arith.addf %12, %14 : vector<1x128xf32>
    %c0_10 = arith.constant 0 : index
    %c0_11 = arith.constant 0 : index
    %16 = vector.load %arg6[%c0_10, %c0_11] : memref<1x128xf32, #tpu.memory_space<vmem>>, vector<1x128xf32>
    tpu.vector_store %arg6[%c0_10, %c0_11], %15 {strides = array<i32>} : memref<1x128xf32, #tpu.memory_space<vmem>>, vector<1x128xf32>,
    return
  }
  func.func @transform_0(%arg0: i32) -> (i32, i32) {
    %c0_i32 = arith.constant 0 : i32
    %c0_i32_0 = arith.constant 0 : i32
    return %c0_i32, %arg0 : i32, i32
  }
  func.func @transform_1(%arg0: i32) -> (i32, i32) {
    %c0_i32 = arith.constant 0 : i32
    %c0_i32_0 = arith.constant 0 : i32
    %c0_i32_1 = arith.constant 0 : i32
    return %c0_i32, %c0_i32_0 : i32, i32
  }
  func.func @transform_2(%arg0: i32) -> (i32, i32) {
    %c0_i32 = arith.constant 0 : i32
    %c0_i32_0 = arith.constant 0 : i32
    %c0_i32_1 = arith.constant 0 : i32
    return %c0_i32, %c0_i32_0 : i32, i32
  }
  func.func @transform_3(%arg0: i32) -> (i32, i32) {
    %c0_i32 = arith.constant 0 : i32
    %c0_i32_0 = arith.constant 0 : i32
    %c0_i32_1 = arith.constant 0 : i32
    return %c0_i32, %c0_i32_0 : i32, i32
  }
  func.func @transform_4(%arg0: i32) -> i32 {
    %c0_i32 = arith.constant 0 : i32
    %c0_i32_0 = arith.constant 0 : i32
    return %c0_i32 : i32
  }
  func.func @transform_5(%arg0: i32) -> (i32, i32) {
    %c0_i32 = arith.constant 0 : i32
    %c0_i32_0 = arith.constant 0 : i32
    return %c0_i32, %arg0 : i32, i32
  }
}

</mosaic_0001>

<bundles_post_ra>
// kernel: tpu_custom_call.1
= control target key start
LH: loop header
LB: loop body
LE: loop exit
PB: predicated region body
PF: predicated region fallthrough
CT: control target
= control target key end

     0   :  { %vm44_vm0 = vcmask 1045504   ;;  %vm37_vm1 = vcmask 48128   ;;  %v205_v4 = vmov 0   ;;  %s273_s0 = inlined_call_operand.vmem [shape: f32[6,128], index: 0, kind: input, shape index: {}]   ;;  %s274_s1 = inlined_call_operand.vmem [shape: f32[15,6], index: 1, kind: input, shape index: {}]   ;;  %s275_s2 = inlined_call_operand.vmem [shape: f32[15,1], index: 2, kind: input, shape index: {}]   ;;  %s276_s3 = inlined_call_operand.vmem [shape: f32[15,1], index: 3, kind: input, shape index: {}]   ;;  %s277_s4 = inlined_call_operand.<no memory space> [shape: f32[1], index: 4, kind: input, shape index: {}]   ;;  %s278_s5 = inlined_call_operand.hbm [shape: f32[1,128], index: 5, kind: output, shape index: {}]  }
   0x1   :  { %v22_v0 = vld [vmem:[%s273_s0] sm:$0x3f]  ;;  %v24_v2 = vld [vmem:[%s274_s1 + $0x8] sm:$0x7f]  ;;  %179 = vset.pattern.permute.xlu0 %v205_v4 }
   0x2   :  { %v23_v1 = vld [vmem:[%s274_s1] sm:$0xff]  ;;  %172 = vmatprep.subr.msk.mxu0 %vm44_vm0, %v22_v0  ;;  %v26_v3 = vld [vmem:[%s275_s2 + $0x8] sm:$0x7f] }
   0x3   :  { %174 = vmatprep.mubr.msk.f32.mxu0 %vm37_vm1, %v23_v1  ;;  %173 = vmatpush3.msk.msra.mxu0 %vm44_vm0, %v22_v0  ;;  %v126_v5 = vld [vmem:[%s276_s3 + $0x8] sm:$0x7f] }
   0x4   :  { %11 = vsyncpa [#allocation4], 0  ;;  %175 = vmatmul.mubr.msk.f32.vlgmr.msra.gmra.mrb[0].mxu0 %vm37_vm1, %v24_v2  ;;  %34 = vperm.xlu0 %179, %v26_v3   ;;  %v25_v6 = vld [vmem:[%s275_s2] sm:$0xff]  ;;  %vm139_vm2 = vcmask 1046528   ;;  %v149_v27 = vstv %s277_s4  ;;  %s206_s30 = smov [#allocation3]  }
   0x5   :  { %180 = vset.pattern.permute.xlu1 %v205_v4  ;;  %v125_v7 = vld [vmem:[%s276_s3] sm:$0xff]  ;;  %s158_s6 = sshll.u32 %s206_s30, 4  ;;  %s159_s6 = int_to_ptr.vmem [resolvable:$true] %s158_s6 }
   0x6   :  { %134 = vperm.xlu1 %180, %v126_v5   ;;  %s181_s7 = scalar_lea.vmem %s159_s6, 16  ;;  %s185_s8 = scalar_lea.vmem %s159_s6, 32 }
   0x7   :  { %p182_p0 = scmp.ne.s32.totalorder %s159_s6, %s181_s7  ;;  %p186_p1 = scmp.lt.s32.totalorder %s159_s6, %s159_s6 }
   0x8   :  { %29 = vperm.xlu0 %179, %v25_v6   ;;  %p187_p2 = scmp.lt.s32.totalorder %s185_s8, %s181_s7 }
   0xa   :  { %129 = vperm.xlu1 %180, %v125_v7   ;;  %p188_p3 = por %p187_p2, %p186_p1 }
   0xc   :  { %p189_p4 = pnand %p188_p3, %p182_p0 }
  0x83   :  { %v35_v8 = vpop.permute.xlu0 %34 }
  0x85   :  { %v135_v9 = vpop.permute.xlu1 %134 }
  0x87   :  { %v30_v11 = vpop.permute.xlu0 %29 }
  0x89   :  { %v130_v18 = vpop.permute.xlu1 %129 }
  0xd7   :  { %v176_v10 = vpop.f32.mrb[0].mxu0 }
  0xd8   :  { %v120_v12 = vadd.f32 %v176_v10, %v35_v8  ;;  %v114_v13 = vpop.f32.mrb[1].mxu0 }
  0xd9   :  { %v115_v14 = vadd.f32 %v114_v13, %v30_v11 }
  0xda   :  { %v124_v15 = vmax.f32 %v120_v12, 0.0 }
  0xdb   :  { %v123_v16 = vmax.f32 %v115_v14, 0.0 }
  0xdc   :  { %v138_v17 = vmul.f32 %v135_v9, %v124_v15 }
  0xdd   :  { %v137_v19 = vmul.f32 %v130_v18, %v123_v16 }
  0xde   :  { %v140_v20 = vsel %vm139_vm2, %v138_v17, 0.0 }
  0xdf   :  { %v141_v21 = vadd.f32 %v140_v20, %v137_v19 }
  0xe1   :  { %v142_v22 = vrot.slane %v141_v21, 4 }
  0xe3   :  { %v143_v23 = vadd.f32 %v142_v22, %v141_v21 }
  0xe5   :  { %v144_v24 = vrot.slane %v143_v23, 2 }
  0xe7   :  { %v145_v25 = vadd.f32 %v144_v24, %v143_v23 }
  0xe9   :  { %v146_v26 = vrot.slane %v145_v25, 1 }
  0xeb   :  { %v147_v28 = vadd.f32 %v146_v26, %v145_v25 }
  0xed   :  { %v150_v29 = vadd.f32 %v149_v27, %v147_v28 }
  0xef   :  { %151 = vst [vmem:[#allocation3] sm:$0x1] %v150_v29 }
  0xf0   :  { %192 = shalt.err (!%p189_p4)
}
  0xf1   :  { %s193_s11 = scalar_lea.hbm %s278_s5, 16 }
  0xf2   :  { %p194_p5 = scmp.ne.s32.totalorder %s278_s5, %s193_s11  ;;  %p197_p6 = scmp.lt.u32.totalorder %s193_s11, %s278_s5 }
  0xf4   :  { %p199_p7 = pnand %p197_p6, %p194_p5 }
  0xf6   :  { %202 = shalt.err (!%p199_p7)
}
  0xf7   :  { %161 = dma.vmem_to_hbm [thread:$0]  %s159_s6, 16, %s278_s5, [#allocation4]  }
  0xf8   :  { %203 = dma.done.wait [#allocation4], 16  }
  0xf9   :  { %204 = vsyncadd [#allocation4], 4294967280 }
  0xfa   :  { %165 = vsyncpa [#allocation4], 1 }

</bundles_post_ra>
